<compile_context>
chip_gen: v7x
topology: tpu7x:2x2x1
jax: 0.10.0
libtpu: 0.0.40
codegen_flags: <defaults>
</compile_context>

<pallas_src>
import functools

import jax
import jax.numpy as jnp
from jax.experimental import pallas as pl
from jax.experimental.pallas import tpu as pltpu

_LANE = 128
_SUBLANE = 8


def _round_up(n, m):
    return ((n + m - 1) // m) * m


def _leaky_relu(x, negative_slope=0.2):
    return jnp.where(x > 0, x, negative_slope * x)


def generator_kernel(x_ref,
                     w1_ref, b1_ref,
                     w2_ref, b2_ref,
                     w3_ref, b3_ref,
                     w4_ref, b4_ref,
                     out_ref):
    # x and all weights arrive as bf16 (cast once in the wrapper) and fully
    # lane-padded; matmuls accumulate in f32 on the MXU, element-wise math
    # stays f32 on the VPU/EUP.
    x = x_ref[...]

    # fc1 + leaky_relu(0.2)   (dropout == identity in eval mode)
    h = jnp.dot(x, w1_ref[...], preferred_element_type=jnp.float32) + b1_ref[...]
    h = _leaky_relu(h)

    # fc2 + leaky_relu(0.2)
    h = jnp.dot(h.astype(jnp.bfloat16), w2_ref[...],
                preferred_element_type=jnp.float32) + b2_ref[...]
    h = _leaky_relu(h)

    # fc3 + leaky_relu(0.2)
    h = jnp.dot(h.astype(jnp.bfloat16), w3_ref[...],
                preferred_element_type=jnp.float32) + b3_ref[...]
    h = _leaky_relu(h)

    # fc4 + tanh  (padded output columns are zero and sliced off outside)
    h = jnp.dot(h.astype(jnp.bfloat16), w4_ref[...],
                preferred_element_type=jnp.float32) + b4_ref[...]
    out_ref[...] = jnp.tanh(h).astype(out_ref.dtype)


@functools.partial(jax.jit, static_argnames=("block_b",))
def generator_forward(x, params, block_b=None):
    """x: (B, input_size) float32. params: dict of (in,out) weights / (1,out) biases."""
    B, in_size = x.shape
    h1 = params["w1"].shape[1]
    h2 = params["w2"].shape[1]
    h3 = params["w3"].shape[1]
    out_size = params["w4"].shape[1]

    # Pad every feature dim to a multiple of 128 lanes (exact, see header).
    in_p = _round_up(in_size, _LANE)
    h1_p = _round_up(h1, _LANE)
    h2_p = _round_up(h2, _LANE)
    h3_p = _round_up(h3, _LANE)
    out_p = _round_up(out_size, _LANE)

    # Batch tile: split into >=2 grid steps when possible (v7x megacore), cap
    # at 512 rows so intermediates stay comfortably within vregs/VMEM.
    b8 = _round_up(B, _SUBLANE)
    if block_b is None:
        if b8 <= 2 * _SUBLANE:
            block_b = b8                       # too small to split usefully
        else:
            block_b = min(512, _round_up((b8 + 1) // 2, _SUBLANE))
    block_b = max(_SUBLANE, _round_up(block_b, _SUBLANE))

    grid_b = pl.cdiv(b8, block_b)
    b_pad = grid_b * block_b

    # One-time casts / pads in the wrapper (not per grid step, not per layer).
    x_p = jnp.pad(x.astype(jnp.bfloat16),
                  ((0, b_pad - B), (0, in_p - in_size)))

    def pad_w(w, rows_p, cols_p):
        r, c = w.shape
        return jnp.pad(w.astype(jnp.bfloat16), ((0, rows_p - r), (0, cols_p - c)))

    def pad_b(b, cols_p):
        c = b.shape[-1]
        return jnp.pad(b.astype(jnp.float32).reshape(1, c), ((0, 0), (0, cols_p - c)))

    w1 = pad_w(params["w1"], in_p, h1_p); b1 = pad_b(params["b1"], h1_p)
    w2 = pad_w(params["w2"], h1_p, h2_p); b2 = pad_b(params["b2"], h2_p)
    w3 = pad_w(params["w3"], h2_p, h3_p); b3 = pad_b(params["b3"], h3_p)
    w4 = pad_w(params["w4"], h3_p, out_p); b4 = pad_b(params["b4"], out_p)

    def param_spec(arr):
        # Grid-invariant parameter: full-array block, single-buffered so it
        # does not waste VMEM on double buffering.
        return pl.BlockSpec(arr.shape, lambda i: (0, 0),
                            pipeline_mode=pl.Buffered(buffer_count=1))

    operands = [x_p, w1, b1, w2, b2, w3, b3, w4, b4]
    in_specs = [pl.BlockSpec((block_b, in_p), lambda i: (i, 0))]
    in_specs += [param_spec(a) for a in operands[1:]]
    out_specs = pl.BlockSpec((block_b, out_p), lambda i: (i, 0))

    out = pl.pallas_call(
        generator_kernel,
        out_shape=jax.ShapeDtypeStruct((b_pad, out_p), jnp.float32),
        grid_spec=pltpu.PrefetchScalarGridSpec(
            num_scalar_prefetch=0,
            grid=(grid_b,),
            in_specs=in_specs,
            out_specs=out_specs,
        ),
        compiler_params=pltpu.CompilerParams(
            dimension_semantics=("parallel",),        # megacore sharding on v7x
            vmem_limit_bytes=32 * 1024 * 1024,        # headroom on 64 MiB v7x VMEM
        ),
    )(*operands)

    # Only pay for a depad slice when padding actually occurred.
    if b_pad != B or out_p != out_size:
        out = out[:B, :out_size]
    return out


def init_params(key, input_size, hidden_dim, output_size):
    """Mirrors nn.Linear default init: U(-1/sqrt(fan_in), 1/sqrt(fan_in)).

    Weights stored as (in_features, out_features) — transposed vs. PyTorch.
    Biases stored as (1, out_features) for TPU-friendly 2D layout.
    """
    dims = [(input_size, hidden_dim),
            (hidden_dim, hidden_dim * 2),
            (hidden_dim * 2, hidden_dim * 4),
            (hidden_dim * 4, output_size)]
    params = {}
    for idx, (fan_in, fan_out) in enumerate(dims, start=1):
        key, kw, kb = jax.random.split(key, 3)
        bound = 1.0 / jnp.sqrt(fan_in)
        params[f"w{idx}"] = jax.random.uniform(
            kw, (fan_in, fan_out), jnp.float32, -bound, bound)
        params[f"b{idx}"] = jax.random.uniform(
            kb, (1, fan_out), jnp.float32, -bound, bound)
    return params


def generator_reference_f32(x, params):
    """Plain-JAX f32 reference of the PyTorch forward (eval-mode dropout)."""
    h = _leaky_relu(x @ params["w1"] + params["b1"])
    h = _leaky_relu(h @ params["w2"] + params["b2"])
    h = _leaky_relu(h @ params["w3"] + params["b3"])
    return jnp.tanh(h @ params["w4"] + params["b4"])


def generator_reference_bf16(x, params):
    """Reference with the same bf16-operand / f32-accumulate math as the kernel."""
    def lin(h, wname, bname):
        return jnp.dot(h.astype(jnp.bfloat16),
                       params[wname].astype(jnp.bfloat16),
                       preferred_element_type=jnp.float32) + params[bname]
    h = _leaky_relu(lin(x, "w1", "b1"))
    h = _leaky_relu(lin(h, "w2", "b2"))
    h = _leaky_relu(lin(h, "w3", "b3"))
    return jnp.tanh(lin(h, "w4", "b4"))


if __name__ == "__main__":
    key = jax.random.PRNGKey(0)
    k_param, k_x = jax.random.split(key)

    batch = 20            # deliberately not a multiple of 8: exercises padding
    input_size = 32
    hidden_dim = 32
    output_size = 16

    params = init_params(k_param, input_size, hidden_dim, output_size)
    x = jax.random.normal(k_x, (batch, input_size), jnp.float32)

    # Default (auto block_b): batch split into 2 grid steps (megacore-friendly).
    out = jax.block_until_ready(generator_forward(x, params))
    # Small explicit tile: multi-step grid, exercises single-buffered weight reuse.
    out_tiled = jax.block_until_ready(generator_forward(x, params, block_b=8))

    ref_f32 = generator_reference_f32(x, params)
    ref_bf16 = generator_reference_bf16(x, params)

    assert out.shape == (batch, output_size)
    assert out_tiled.shape == (batch, output_size)
    # Tight check against the same bf16-operand math.
    assert jnp.allclose(out, ref_bf16, atol=1e-3, rtol=1e-3), "mismatch vs bf16 reference"
    assert jnp.allclose(out_tiled, ref_bf16, atol=1e-3, rtol=1e-3), "tiled mismatch vs bf16 reference"
    # Loose check against the exact f32 (PyTorch-semantics) reference.
    assert jnp.allclose(out, ref_f32, atol=5e-2, rtol=5e-2), "mismatch vs f32 reference"

    print("KERNEL_OK")
</pallas_src>

<mosaic_0001>
module attributes {stable_mosaic.version = 11 : i64} {
  func.func @generator_kernel(%arg0: i32, %arg1: memref<16x128xbf16, #tpu.memory_space<vmem>>, %arg2: memref<128x128xbf16, #tpu.memory_space<vmem>>, %arg3: memref<1x128xf32, #tpu.memory_space<vmem>>, %arg4: memref<128x128xbf16, #tpu.memory_space<vmem>>, %arg5: memref<1x128xf32, #tpu.memory_space<vmem>>, %arg6: memref<128x128xbf16, #tpu.memory_space<vmem>>, %arg7: memref<1x128xf32, #tpu.memory_space<vmem>>, %arg8: memref<128x128xbf16, #tpu.memory_space<vmem>>, %arg9: memref<1x128xf32, #tpu.memory_space<vmem>>, %arg10: memref<16x128xf32, #tpu.memory_space<vmem>>) attributes {dimension_semantics = [#tpu.dimension_semantics<parallel>], iteration_bounds = array<i64: 2>, scalar_prefetch = 0 : i64, scratch_operands = 0 : i64, tpu.core_type = #tpu.core_type<tc>, window_params = [{transform_indices = @transform_0, window_bounds = array<i64: 16, 128>}, {pipeline_mode = #tpu.pipeline_mode<synchronous>, transform_indices = @transform_1, window_bounds = array<i64: 128, 128>}, {pipeline_mode = #tpu.pipeline_mode<synchronous>, transform_indices = @transform_2, window_bounds = array<i64: 1, 128>}, {pipeline_mode = #tpu.pipeline_mode<synchronous>, transform_indices = @transform_3, window_bounds = array<i64: 128, 128>}, {pipeline_mode = #tpu.pipeline_mode<synchronous>, transform_indices = @transform_4, window_bounds = array<i64: 1, 128>}, {pipeline_mode = #tpu.pipeline_mode<synchronous>, transform_indices = @transform_5, window_bounds = array<i64: 128, 128>}, {pipeline_mode = #tpu.pipeline_mode<synchronous>, transform_indices = @transform_6, window_bounds = array<i64: 1, 128>}, {pipeline_mode = #tpu.pipeline_mode<synchronous>, transform_indices = @transform_7, window_bounds = array<i64: 128, 128>}, {pipeline_mode = #tpu.pipeline_mode<synchronous>, transform_indices = @transform_8, window_bounds = array<i64: 1, 128>}, {transform_indices = @transform_9, window_bounds = array<i64: 16, 128>}]} {
    %c0 = arith.constant 0 : index
    %c0_0 = arith.constant 0 : index
    %0 = vector.load %arg1[%c0, %c0_0] : memref<16x128xbf16, #tpu.memory_space<vmem>>, vector<16x128xbf16>
    %c0_1 = arith.constant 0 : index
    %c0_2 = arith.constant 0 : index
    %1 = vector.load %arg2[%c0_1, %c0_2] : memref<128x128xbf16, #tpu.memory_space<vmem>>, vector<128x128xbf16>
    %cst = arith.constant dense<0.000000e+00> : vector<16x128xf32>
    %2 = tpu.matmul %0, %1, %cst {dimension_numbers = #tpu.dot_dimension_numbers<[1], [0], [0], [1], [0, 0, 1, 1], [], []>} : vector<16x128xbf16>, vector<128x128xbf16>, vector<16x128xf32> -> vector<16x128xf32>
    %c0_3 = arith.constant 0 : index
    %c0_4 = arith.constant 0 : index
    %3 = vector.load %arg3[%c0_3, %c0_4] : memref<1x128xf32, #tpu.memory_space<vmem>>, vector<1x128xf32>
    %4 = vector.broadcast %3 : vector<1x128xf32> to vector<16x128xf32>
    %5 = arith.addf %2, %4 : vector<16x128xf32>
    %cst_5 = arith.constant 0.000000e+00 : f32
    %6 = vector.broadcast %cst_5 : f32 to vector<16x128xf32>
    %7 = arith.cmpf ogt, %5, %6 : vector<16x128xf32>
    %cst_6 = arith.constant 2.000000e-01 : f32
    %8 = vector.broadcast %cst_6 : f32 to vector<16x128xf32>
    %9 = arith.mulf %8, %5 : vector<16x128xf32>
    %10 = arith.select %7, %5, %9 : vector<16x128xi1>, vector<16x128xf32>
    %11 = arith.truncf %10 : vector<16x128xf32> to vector<16x128xbf16>
    %c0_7 = arith.constant 0 : index
    %c0_8 = arith.constant 0 : index
    %12 = vector.load %arg4[%c0_7, %c0_8] : memref<128x128xbf16, #tpu.memory_space<vmem>>, vector<128x128xbf16>
    %cst_9 = arith.constant dense<0.000000e+00> : vector<16x128xf32>
    %13 = tpu.matmul %11, %12, %cst_9 {dimension_numbers = #tpu.dot_dimension_numbers<[1], [0], [0], [1], [0, 0, 1, 1], [], []>} : vector<16x128xbf16>, vector<128x128xbf16>, vector<16x128xf32> -> vector<16x128xf32>
    %c0_10 = arith.constant 0 : index
    %c0_11 = arith.constant 0 : index
    %14 = vector.load %arg5[%c0_10, %c0_11] : memref<1x128xf32, #tpu.memory_space<vmem>>, vector<1x128xf32>
    %15 = vector.broadcast %14 : vector<1x128xf32> to vector<16x128xf32>
    %16 = arith.addf %13, %15 : vector<16x128xf32>
    %cst_12 = arith.constant 0.000000e+00 : f32
    %17 = vector.broadcast %cst_12 : f32 to vector<16x128xf32>
    %18 = arith.cmpf ogt, %16, %17 : vector<16x128xf32>
    %cst_13 = arith.constant 2.000000e-01 : f32
    %19 = vector.broadcast %cst_13 : f32 to vector<16x128xf32>
    %20 = arith.mulf %19, %16 : vector<16x128xf32>
    %21 = arith.select %18, %16, %20 : vector<16x128xi1>, vector<16x128xf32>
    %22 = arith.truncf %21 : vector<16x128xf32> to vector<16x128xbf16>
    %c0_14 = arith.constant 0 : index
    %c0_15 = arith.constant 0 : index
    %23 = vector.load %arg6[%c0_14, %c0_15] : memref<128x128xbf16, #tpu.memory_space<vmem>>, vector<128x128xbf16>
    %cst_16 = arith.constant dense<0.000000e+00> : vector<16x128xf32>
    %24 = tpu.matmul %22, %23, %cst_16 {dimension_numbers = #tpu.dot_dimension_numbers<[1], [0], [0], [1], [0, 0, 1, 1], [], []>} : vector<16x128xbf16>, vector<128x128xbf16>, vector<16x128xf32> -> vector<16x128xf32>
    %c0_17 = arith.constant 0 : index
    %c0_18 = arith.constant 0 : index
    %25 = vector.load %arg7[%c0_17, %c0_18] : memref<1x128xf32, #tpu.memory_space<vmem>>, vector<1x128xf32>
    %26 = vector.broadcast %25 : vector<1x128xf32> to vector<16x128xf32>
    %27 = arith.addf %24, %26 : vector<16x128xf32>
    %cst_19 = arith.constant 0.000000e+00 : f32
    %28 = vector.broadcast %cst_19 : f32 to vector<16x128xf32>
    %29 = arith.cmpf ogt, %27, %28 : vector<16x128xf32>
    %cst_20 = arith.constant 2.000000e-01 : f32
    %30 = vector.broadcast %cst_20 : f32 to vector<16x128xf32>
    %31 = arith.mulf %30, %27 : vector<16x128xf32>
    %32 = arith.select %29, %27, %31 : vector<16x128xi1>, vector<16x128xf32>
    %33 = arith.truncf %32 : vector<16x128xf32> to vector<16x128xbf16>
    %c0_21 = arith.constant 0 : index
    %c0_22 = arith.constant 0 : index
    %34 = vector.load %arg8[%c0_21, %c0_22] : memref<128x128xbf16, #tpu.memory_space<vmem>>, vector<128x128xbf16>
    %cst_23 = arith.constant dense<0.000000e+00> : vector<16x128xf32>
    %35 = tpu.matmul %33, %34, %cst_23 {dimension_numbers = #tpu.dot_dimension_numbers<[1], [0], [0], [1], [0, 0, 1, 1], [], []>} : vector<16x128xbf16>, vector<128x128xbf16>, vector<16x128xf32> -> vector<16x128xf32>
    %c0_24 = arith.constant 0 : index
    %c0_25 = arith.constant 0 : index
    %36 = vector.load %arg9[%c0_24, %c0_25] : memref<1x128xf32, #tpu.memory_space<vmem>>, vector<1x128xf32>
    %37 = vector.broadcast %36 : vector<1x128xf32> to vector<16x128xf32>
    %38 = arith.addf %35, %37 : vector<16x128xf32>
    %39 = math.tanh %38 : vector<16x128xf32>
    %c0_26 = arith.constant 0 : index
    %c0_27 = arith.constant 0 : index
    %40 = vector.load %arg10[%c0_26, %c0_27] : memref<16x128xf32, #tpu.memory_space<vmem>>, vector<16x128xf32>
    tpu.vector_store %arg10[%c0_26, %c0_27], %39 {strides = array<i32>} : memref<16x128xf32, #tpu.memory_space<vmem>>, vector<16x128xf32>,
    return
  }
  func.func @transform_0(%arg0: i32) -> (i32, i32) {
    %c0_i32 = arith.constant 0 : i32
    %c0_i32_0 = arith.constant 0 : i32
    return %arg0, %c0_i32 : i32, i32
  }
  func.func @transform_1(%arg0: i32) -> (i32, i32) {
    %c0_i32 = arith.constant 0 : i32
    %c0_i32_0 = arith.constant 0 : i32
    %c0_i32_1 = arith.constant 0 : i32
    return %c0_i32, %c0_i32_0 : i32, i32
  }
  func.func @transform_2(%arg0: i32) -> (i32, i32) {
    %c0_i32 = arith.constant 0 : i32
    %c0_i32_0 = arith.constant 0 : i32
    %c0_i32_1 = arith.constant 0 : i32
    return %c0_i32, %c0_i32_0 : i32, i32
  }
  func.func @transform_3(%arg0: i32) -> (i32, i32) {
    %c0_i32 = arith.constant 0 : i32
    %c0_i32_0 = arith.constant 0 : i32
    %c0_i32_1 = arith.constant 0 : i32
    return %c0_i32, %c0_i32_0 : i32, i32
  }
  func.func @transform_4(%arg0: i32) -> (i32, i32) {
    %c0_i32 = arith.constant 0 : i32
    %c0_i32_0 = arith.constant 0 : i32
    %c0_i32_1 = arith.constant 0 : i32
    return %c0_i32, %c0_i32_0 : i32, i32
  }
  func.func @transform_5(%arg0: i32) -> (i32, i32) {
    %c0_i32 = arith.constant 0 : i32
    %c0_i32_0 = arith.constant 0 : i32
    %c0_i32_1 = arith.constant 0 : i32
    return %c0_i32, %c0_i32_0 : i32, i32
  }
  func.func @transform_6(%arg0: i32) -> (i32, i32) {
    %c0_i32 = arith.constant 0 : i32
    %c0_i32_0 = arith.constant 0 : i32
    %c0_i32_1 = arith.constant 0 : i32
    return %c0_i32, %c0_i32_0 : i32, i32
  }
  func.func @transform_7(%arg0: i32) -> (i32, i32) {
    %c0_i32 = arith.constant 0 : i32
    %c0_i32_0 = arith.constant 0 : i32
    %c0_i32_1 = arith.constant 0 : i32
    return %c0_i32, %c0_i32_0 : i32, i32
  }
  func.func @transform_8(%arg0: i32) -> (i32, i32) {
    %c0_i32 = arith.constant 0 : i32
    %c0_i32_0 = arith.constant 0 : i32
    %c0_i32_1 = arith.constant 0 : i32
    return %c0_i32, %c0_i32_0 : i32, i32
  }
  func.func @transform_9(%arg0: i32) -> (i32, i32) {
    %c0_i32 = arith.constant 0 : i32
    %c0_i32_0 = arith.constant 0 : i32
    return %arg0, %c0_i32 : i32, i32
  }
}

</mosaic_0001>

<bundles_post_ra>
// kernel: generator_forward.1
= control target key start
LH: loop header
LB: loop body
LE: loop exit
PB: predicated region body
PF: predicated region fallthrough
CT: control target
= control target key end

     0   :  { %s1145_s30 = smov 0   ;;  %s1317_s0 = inlined_call_operand.vmem [shape: bf16[32,128], index: 0, kind: input, shape index: {}]   ;;  %s1318_s1 = inlined_call_operand.vmem [shape: bf16[128,128], index: 1, kind: input, shape index: {}]   ;;  %s1319_s2 = inlined_call_operand.vmem [shape: f32[1,128], index: 2, kind: input, shape index: {}]   ;;  %s1320_s3 = inlined_call_operand.vmem [shape: bf16[128,128], index: 3, kind: input, shape index: {}]   ;;  %s1321_s4 = inlined_call_operand.vmem [shape: f32[1,128], index: 4, kind: input, shape index: {}]   ;;  %s1322_s5 = inlined_call_operand.vmem [shape: bf16[128,128], index: 5, kind: input, shape index: {}]   ;;  %s1323_s6 = inlined_call_operand.vmem [shape: f32[1,128], index: 6, kind: input, shape index: {}]   ;;  %s1324_s7 = inlined_call_operand.vmem [shape: bf16[128,128], index: 7, kind: input, shape index: {}]   ;;  %s1325_s8 = inlined_call_operand.vmem [shape: f32[1,128], index: 8, kind: input, shape index: {}]   ;;  %s1326_s9 = inlined_call_operand.vmem [shape: f32[32,128], index: 9, kind: output, shape index: {}]  }
   0x1 LB: > { %s874_s10 = sadd.s32 4294967295, %s1091_s30   ;;  %p878_p0 = scmp.ge.s32.totalorder %s1091_s30, 1  ;;  %s1091_s30 = sphi %s1145_s30, %s19_s30  }
   0x2   : > { %p288_p1 = scmp.lt.s32.totalorder %s1091_s30, 3 }
   0x4   : > { %p289_p2 = pnand %p878_p0, %p288_p1 }
   0x5   : > { %v1048_v0 = vld [vmem:[%s1318_s1] sm:$0xff] (!%p289_p2)   ;;  %v1093_v1 = vmov (!%p289_p2), 0.0   ;;  %v1049_v2 = vld [vmem:[%s1318_s1 + $0x8] sm:$0xff] (!%p289_p2)   ;;  %vm1094_vm0 = vmmov (!%p289_p2), 0   ;;  %s879_s15 = sshll.u32 (!%p289_p2), %s874_s10, 1  ;;  %v1050_v3 = vld [vmem:[%s1318_s1 + $0x10] sm:$0xff] (!%p289_p2)  }
   0x6   : > { %292 = sbr.rel (%p289_p2) target bundleno = 929 (0x3a1), region = 56  ;;  %958 = vmatprep.subr.bf16.mxu0 (!%p289_p2), %v1093_v1  ;;  %978 = vmatprep.subr.bf16.mxu1 (!%p289_p2), %v1093_v1  ;;  %p325_p3 = scmp.lt.s32.totalorder (!%p289_p2), %s879_s15, 3  ;;  %v1057_v4 = vld [vmem:[%s1320_s3] sm:$0xff] (!%p289_p2)   ;;  %v1051_v5 = vld [vmem:[%s1318_s1 + $0x18] sm:$0xff] (!%p289_p2)   ;;  %v1058_v6 = vld [vmem:[%s1320_s3 + $0x8] sm:$0xff] (!%p289_p2)  }
   0x7   : > { %959 = vmatpush3.bf16.msra.mxu0 (!%p289_p2), %v1048_v0  ;;  %974 = vmatprep.mubr.msk.bf16.mxu0 (!%p289_p2), %vm1094_vm0, %v1093_v1  ;;  %v1052_v7 = vld [vmem:[%s1318_s1 + $0x20] sm:$0xff] (!%p289_p2)   ;;  %v1059_v8 = vld [vmem:[%s1320_s3 + $0x10] sm:$0xff] (!%p289_p2)   ;;  %v1053_v9 = vld [vmem:[%s1318_s1 + $0x28] sm:$0xff] (!%p289_p2)  }
   0x8   : > { %960 = vmatprep.subr.bf16.mxu0 (!%p289_p2), %v1093_v1  ;;  %994 = vmatprep.mubr.msk.bf16.mxu1 (!%p289_p2), %vm1094_vm0, %v1093_v1  ;;  %v1060_v10 = vld [vmem:[%s1320_s3 + $0x18] sm:$0xff] (!%p289_p2)   ;;  %v1054_v11 = vld [vmem:[%s1318_s1 + $0x30] sm:$0xff] (!%p289_p2)   ;;  %v1061_v12 = vld [vmem:[%s1320_s3 + $0x20] sm:$0xff] (!%p289_p2)  }
   0x9   : > { %979 = vmatpush3.bf16.msra.mxu1 (!%p289_p2), %v1057_v4  ;;  %v1055_v13 = vld [vmem:[%s1318_s1 + $0x38] sm:$0xff] (!%p289_p2)   ;;  %v1062_v14 = vld [vmem:[%s1320_s3 + $0x28] sm:$0xff] (!%p289_p2)   ;;  %v1063_v16 = vld [vmem:[%s1320_s3 + $0x30] sm:$0xff] (!%p289_p2)  }
   0xa   : > { %980 = vmatprep.subr.bf16.mxu1 (!%p289_p2), %v1093_v1  ;;  %v1064_v17 = vld [vmem:[%s1320_s3 + $0x38] sm:$0xff] (!%p289_p2)   ;;  %v1065_v18 = vld [vmem:[%s1322_s5] sm:$0xff] (!%p289_p2)   ;;  %v1066_v19 = vld [vmem:[%s1322_s5 + $0x8] sm:$0xff] (!%p289_p2)  }
   0xb   : > { %961 = vmatpush3.bf16.msra.mxu0 (!%p289_p2), %v1049_v2  ;;  %v1067_v20 = vld [vmem:[%s1322_s5 + $0x10] sm:$0xff] (!%p289_p2)   ;;  %v1068_v21 = vld [vmem:[%s1322_s5 + $0x18] sm:$0xff] (!%p289_p2)   ;;  %v1069_v22 = vld [vmem:[%s1322_s5 + $0x20] sm:$0xff] (!%p289_p2)  }
   0xc   : > { %962 = vmatprep.subr.bf16.mxu0 (!%p289_p2), %v1093_v1  ;;  %v1070_v23 = vld [vmem:[%s1322_s5 + $0x28] sm:$0xff] (!%p289_p2)   ;;  %v883_v24 = vld [vmem:[%s1319_s2] ss:$0 sm:$0xff] (!%p289_p2)  ;;  %v1071_v36 = vld [vmem:[%s1322_s5 + $0x30] sm:$0xff] (!%p289_p2)  }
   0xd   : > { %s1328_s15 = smov (!%p325_p3, %s879_s15), 3  ;;  %981 = vmatpush3.bf16.msra.mxu1 %v1058_v6  ;;  %v1072_v37 = vld [vmem:[%s1322_s5 + $0x38] sm:$0xff]   ;;  %v1073_v38 = vld [vmem:[%s1324_s7] sm:$0xff]   ;;  %v1074_v39 = vld [vmem:[%s1324_s7 + $0x8] sm:$0xff]  }
   0xe   : > { %s880_s18 = sshll.u32 %s1328_s15, 2  ;;  %982 = vmatprep.subr.bf16.mxu1 %v1093_v1  ;;  %v1075_v40 = vld [vmem:[%s1324_s7 + $0x10] sm:$0xff]   ;;  %v1076_v41 = vld [vmem:[%s1324_s7 + $0x18] sm:$0xff]   ;;  %v1077_v42 = vld [vmem:[%s1324_s7 + $0x20] sm:$0xff]   ;;  %s882_s11 = sshll.u32 %s1328_s15, 3 }
   0xf   : > { %s1176_s21 = scalar_lea.vmem %s1317_s0, %s880_s18  ;;  %963 = vmatpush3.bf16.msra.mxu0 %v1050_v3  ;;  %v1078_v43 = vld [vmem:[%s1324_s7 + $0x28] sm:$0xff]   ;;  %v893_v44 = vld [vmem:[%s1321_s4] ss:$0 sm:$0xff]  ;;  %v1079_v56 = vld [vmem:[%s1324_s7 + $0x30] sm:$0xff]   ;;  %s334_s14 = scalar_lea.vmem %s1326_s9, %s882_s11 }
  0x10   : > { %964 = vmatprep.subr.bf16.mxu0 %v1093_v1  ;;  %v1056_v15 = vld [vmem:[%s1176_s21] sm:$0xff]   ;;  %v1080_v57 = vld [vmem:[%s1324_s7 + $0x38] sm:$0xff]  }
  0x11   : > { %983 = vmatpush3.bf16.msra.mxu1 %v1059_v8  ;;  %v902_v58 = vld [vmem:[%s1323_s6] ss:$0 sm:$0xff] }
  0x12   : > { %984 = vmatprep.subr.bf16.mxu1 %v1093_v1  ;;  %v911_v6 = vld [vmem:[%s1325_s8] ss:$0 sm:$0xff] }
  0x13   : > { %965 = vmatpush3.bf16.msra.mxu0 %v1051_v5 }
  0x14   : > { %966 = vmatprep.subr.bf16.mxu0 %v1093_v1 }
  0x15   : > { %985 = vmatpush3.bf16.msra.mxu1 %v1060_v10 }
  0x16   : > { %986 = vmatprep.subr.bf16.mxu1 %v1093_v1 }
  0x17   : > { %967 = vmatpush3.bf16.msra.mxu0 %v1052_v7 }
  0x18   : > { %968 = vmatprep.subr.bf16.mxu0 %v1093_v1 }
  0x19   : > { %987 = vmatpush3.bf16.msra.mxu1 %v1061_v12 }
  0x1a   : > { %988 = vmatprep.subr.bf16.mxu1 %v1093_v1 }
  0x1b   : > { %969 = vmatpush3.bf16.msra.mxu0 %v1053_v9 }
  0x1c   : > { %970 = vmatprep.subr.bf16.mxu0 %v1093_v1 }
  0x1d   : > { %989 = vmatpush3.bf16.msra.mxu1 %v1062_v14 }
  0x1e   : > { %990 = vmatprep.subr.bf16.mxu1 %v1093_v1 }
  0x1f   : > { %971 = vmatpush3.bf16.msra.mxu0 %v1054_v11 }
  0x20   : > { %972 = vmatprep.subr.bf16.mxu0 %v1093_v1 }
  0x21   : > { %991 = vmatpush3.bf16.msra.mxu1 %v1063_v16 }
  0x22   : > { %992 = vmatprep.subr.bf16.mxu1 %v1093_v1 }
  0x23   : > { %973 = vmatpush3.bf16.msra.mxu0 %v1055_v13 }
  0x24   : > { %998 = vmatprep.subr.bf16.mxu0 %v1093_v1 }
  0x25   : > { %993 = vmatpush3.bf16.msra.mxu1 %v1064_v17 }
  0x26   : > { %975 = vmatmul.mubr.bf16.vlgmr.msra.gmra.mrb[0].mxu0 %v1056_v15  ;;  %1018 = vmatprep.subr.bf16.mxu1 %v1093_v1 }
  0x27   : > { %1014 = vmatprep.mubr.msk.bf16.mxu0 %vm1094_vm0, %v1093_v1  ;;  %999 = vmatpush3.bf16.msra.mxu0 %v1065_v18 }
  0x28   : > { %1000 = vmatprep.subr.bf16.mxu0 %v1093_v1 }
  0x2b   : > { %1001 = vmatpush3.bf16.msra.mxu0 %v1066_v19 }
  0x2c   : > { %1002 = vmatprep.subr.bf16.mxu0 %v1093_v1 }
  0x2f   : > { %1003 = vmatpush3.bf16.msra.mxu0 %v1067_v20 }
  0x30   : > { %1004 = vmatprep.subr.bf16.mxu0 %v1093_v1 }
  0x33   : > { %1005 = vmatpush3.bf16.msra.mxu0 %v1068_v21 }
  0x34   : > { %1006 = vmatprep.subr.bf16.mxu0 %v1093_v1 }
  0x37   : > { %1007 = vmatpush3.bf16.msra.mxu0 %v1069_v22 }
  0x38   : > { %1008 = vmatprep.subr.bf16.mxu0 %v1093_v1 }
  0x3b   : > { %1009 = vmatpush3.bf16.msra.mxu0 %v1070_v23 }
  0x3c   : > { %1010 = vmatprep.subr.bf16.mxu0 %v1093_v1 }
  0x3f   : > { %1011 = vmatpush3.bf16.msra.mxu0 %v1071_v36 }
  0x40   : > { %1012 = vmatprep.subr.bf16.mxu0 %v1093_v1 }
  0x43   : > { %1013 = vmatpush3.bf16.msra.mxu0 %v1072_v37 }
  0xf9   : > { %v450_v25 = vpop.f32.mrb[0].mxu0 }
  0xfa   : > { %v451_v26 = vadd.f32 %v883_v24, %v450_v25  ;;  %v976_v27 = vpop.f32.mrb[1].mxu0 }
  0xfb   : > { %v453_v28 = vpop.f32.mrb[2].mxu0 }
  0xfc   : > { %v459_v29 = vmul.f32 0.2, %v451_v26  ;;  %v454_v30 = vadd.f32 %v883_v24, %v453_v28  ;;  %v977_v31 = vpop.f32.mrb[3].mxu0  ;;  %vm457_vm1 = vcmp.gt.f32.partialorder %v451_v26, 0.0 }
  0xfe   : > { %vm458_vm2 = vcmp.gt.f32.partialorder %v454_v30, 0.0  ;;  %v460_v32 = vmul.f32 0.2, %v454_v30  ;;  %v461_v33 = vsel %vm457_vm1, %v451_v26, %v459_v29 }
 0x100   : > { %v462_v34 = vsel %vm458_vm2, %v454_v30, %v460_v32 }
 0x101   : > { %v463_v35 = vpack.c.bf16 %v462_v34, %v461_v33 }
 0x103   : > { %995 = vmatmul.mubr.bf16.vlgmr.msra.gmra.mrb[0].mxu1 %v463_v35 }
 0x104   : > { %1034 = vmatprep.mubr.msk.bf16.mxu1 %vm1094_vm0, %v1093_v1  ;;  %1019 = vmatpush3.bf16.msra.mxu1 %v1073_v38 }
 0x105   : > { %1020 = vmatprep.subr.bf16.mxu1 %v1093_v1 }
 0x108   : > { %1021 = vmatpush3.bf16.msra.mxu1 %v1074_v39 }
 0x109   : > { %1022 = vmatprep.subr.bf16.mxu1 %v1093_v1 }
 0x10c   : > { %1023 = vmatpush3.bf16.msra.mxu1 %v1075_v40 }
 0x10d   : > { %1024 = vmatprep.subr.bf16.mxu1 %v1093_v1 }
 0x110   : > { %1025 = vmatpush3.bf16.msra.mxu1 %v1076_v41 }
 0x111   : > { %1026 = vmatprep.subr.bf16.mxu1 %v1093_v1 }
 0x114   : > { %1027 = vmatpush3.bf16.msra.mxu1 %v1077_v42 }
 0x115   : > { %1028 = vmatprep.subr.bf16.mxu1 %v1093_v1 }
 0x118   : > { %1029 = vmatpush3.bf16.msra.mxu1 %v1078_v43 }
 0x119   : > { %1030 = vmatprep.subr.bf16.mxu1 %v1093_v1 }
 0x11c   : > { %1031 = vmatpush3.bf16.msra.mxu1 %v1079_v56 }
 0x11d   : > { %1032 = vmatprep.subr.bf16.mxu1 %v1093_v1 }
 0x120   : > { %1033 = vmatpush3.bf16.msra.mxu1 %v1080_v57 }
 0x1d6   : > { %v569_v45 = vpop.f32.mrb[0].mxu1 }
 0x1d7   : > { %v570_v46 = vadd.f32 %v893_v44, %v569_v45  ;;  %v996_v47 = vpop.f32.mrb[1].mxu1 }
 0x1d8   : > { %v572_v48 = vpop.f32.mrb[2].mxu1 }
 0x1d9   : > { %v578_v49 = vmul.f32 0.2, %v570_v46  ;;  %v573_v50 = vadd.f32 %v893_v44, %v572_v48  ;;  %v997_v51 = vpop.f32.mrb[3].mxu1  ;;  %vm576_vm3 = vcmp.gt.f32.partialorder %v570_v46, 0.0 }
 0x1db   : > { %vm577_vm4 = vcmp.gt.f32.partialorder %v573_v50, 0.0  ;;  %v579_v52 = vmul.f32 0.2, %v573_v50  ;;  %v580_v53 = vsel %vm576_vm3, %v570_v46, %v578_v49 }
 0x1dd   : > { %v581_v54 = vsel %vm577_vm4, %v573_v50, %v579_v52 }
 0x1de   : > { %v582_v55 = vpack.c.bf16 %v581_v54, %v580_v53 }
 0x1e0   : > { %1015 = vmatmul.mubr.bf16.vlgmr.msra.gmra.mrb[4].mxu0 %v582_v55 }
 0x2b3   : > { %v688_v59 = vpop.f32.mrb[4].mxu0 }
 0x2b4   : > { %v689_v60 = vadd.f32 %v902_v58, %v688_v59  ;;  %v1016_v61 = vpop.f32.mrb[5].mxu0 }
 0x2b5   : > { %v691_v62 = vpop.f32.mrb[6].mxu0 }
 0x2b6   : > { %v697_v63 = vmul.f32 0.2, %v689_v60  ;;  %v692_v0 = vadd.f32 %v902_v58, %v691_v62  ;;  %v1017_v2 = vpop.f32.mrb[7].mxu0  ;;  %vm695_vm5 = vcmp.gt.f32.partialorder %v689_v60, 0.0 }
 0x2b8   : > { %vm696_vm6 = vcmp.gt.f32.partialorder %v692_v0, 0.0  ;;  %v698_v1 = vmul.f32 0.2, %v692_v0  ;;  %v699_v3 = vsel %vm695_vm5, %v689_v60, %v697_v63 }
 0x2ba   : > { %v700_v4 = vsel %vm696_vm6, %v692_v0, %v698_v1 }
 0x2bb   : > { %v701_v5 = vpack.c.bf16 %v700_v4, %v699_v3 }
 0x2bd   : > { %1035 = vmatmul.mubr.bf16.vlgmr.msra.gmra.mrb[4].mxu1 %v701_v5 }
 0x390   : > { %v807_v7 = vpop.f32.mrb[4].mxu1 }
 0x391   : > { %v808_v8 = vadd.f32 %v911_v6, %v807_v7  ;;  %v1036_v9 = vpop.f32.mrb[5].mxu1 }
 0x392   : > { %v810_v10 = vpop.f32.mrb[6].mxu1 }
 0x393   : > { %1081 = vtanh.f32 %v808_v8  ;;  %v811_v11 = vadd.f32 %v911_v6, %v810_v10  ;;  %v1037_v12 = vpop.f32.mrb[7].mxu1 }
 0x395   : > { %1083 = vtanh.f32 %v811_v11 }
 0x39d   : > { %v1082_v13 = vpop.eup %1081 }
 0x39e   : > { %816 = vst [vmem:[%s334_s14] sm:$0xff] %v1082_v13 }
 0x39f   : > { %v1084_v14 = vpop.eup %1083 }
 0x3a0   : > { %817 = vst [vmem:[%s334_s14 + $0x8] sm:$0xff] %v1084_v14 }
 0x3a1 PF: > { %s19_s30 = sadd.s32 1, %s1091_s30  }
 0x3a2   : > { %p16_p4 = scmp.ge.s32.totalorder %s19_s30, 4  }
 0x3a4   :  { %18 = sbr.rel (!%p16_p4) target bundleno = 1 (0x1), region = 86 }

</bundles_post_ra>
